<compile_context>
chip_gen: v5e
topology: v5e:2x2
jax: 0.10.0
libtpu: 0.0.40
codegen_flags: <defaults>
</compile_context>

<pallas_src>
import functools

import jax
import jax.numpy as jnp
from jax.experimental import pallas as pl
from jax.experimental.pallas import tpu as pltpu


def _linear_attention_kernel(bb, nq, nk, d,
                             q_ref, kv_ref,
                             wq_ref, bq_ref,
                             wkv_ref, bkv_ref,
                             o_ref):
    cdt = q_ref.dtype  # MXU operand dtype (input dtype; bf16 if caller casted)

    # ---- Projections: one flattened MXU pass over all packed batch rows.
    # (scale is pre-folded into wq/bq by the wrapper)
    q = jnp.dot(q_ref[...], wq_ref[...],
                preferred_element_type=jnp.float32) + bq_ref[...]       # (bb*nq, d)
    kv = jnp.dot(kv_ref[...], wkv_ref[...],
                 preferred_element_type=jnp.float32) + bkv_ref[...]     # (bb*nk, 2d)
    k = kv[:, :d].reshape(bb, nk, d)
    v = kv[:, d:].reshape(bb, nk, d)

    # ---- softmax(q, dim=-1): per-row over the real d columns (no padding).
    q = jnp.exp(q - jnp.max(q, axis=-1, keepdims=True))
    q_sm = (q / jnp.sum(q, axis=-1, keepdims=True)).reshape(bb, nq, d)

    # ---- softmax(k, dim=-2): over the key-sequence axis, per batch element.
    k = jnp.exp(k - jnp.max(k, axis=1, keepdims=True))
    k_sm = k / jnp.sum(k, axis=1, keepdims=True)

    # ---- context[b] = k[b]^T @ v[b]: contract over Nk directly (no .T).
    context = jnp.einsum("bkd,bke->bde",
                         k_sm.astype(cdt), v.astype(cdt),
                         preferred_element_type=jnp.float32)            # (bb, d, d)

    # ---- out[b] = q_softmax[b] @ context[b]
    out = jnp.einsum("bqd,bde->bqe",
                     q_sm.astype(cdt), context.astype(cdt),
                     preferred_element_type=jnp.float32)                # (bb, nq, d)

    o_ref[...] = out.astype(o_ref.dtype)


def _vmem_budget_and_limit():
    """Per-chip scoped-VMEM limit and a working-set budget derived from it."""
    try:
        cap = int(getattr(pltpu.get_tpu_info(), "vmem_capacity_bytes", 0))
    except Exception:
        cap = 0
    if cap <= 0:
        cap = 64 << 20  # conservative fallback (v7x per-TensorCore VMEM)
    vmem_limit = min(cap * 3 // 4, 64 << 20)
    budget = vmem_limit // 2  # headroom for compiler scratch / pipeline slack
    return budget, vmem_limit


def _pick_batch_block(B, Nq, Nk, D, itemsize, budget):
    """Largest divisor of B whose per-step working set fits the VMEM budget.

    - Caps bb at B//2 so the 'parallel' grid axis has >= 2 steps and both v7x
      TensorCores get work (also an implicit MXU-row-fill maximizer: we take
      the largest bb that fits).
    - Enforces the (8,128) rule: bb*Nq and bb*Nk must be multiples of 8 (or
      the block must equal the whole array, i.e. bb == B).
    - Accounts for double-buffered in/out blocks, the (double-buffered)
      grid-invariant weight blocks, and rough f32 intermediates.
    """
    max_bb = B if B < 2 else B // 2
    best = None
    weights = 2 * itemsize * (D * D + D + 2 * D * D + 2 * D)
    for cand in range(1, max_bb + 1):
        if B % cand:
            continue
        if (cand * Nq) % 8 or (cand * Nk) % 8:
            continue
        blocks = 2 * itemsize * (cand * Nq * D + cand * Nk * D + cand * Nq * D)
        interm = 4 * (2 * cand * Nq * D + 3 * cand * Nk * D
                      + cand * D * D + cand * Nq * D)
        if blocks + weights + interm <= budget:
            best = cand
    if best is None:
        # No legal tiling under the (8,128) rule except whole-array blocks.
        best = B
    return best


def linear_attention(query, key_value, wq, bq, wk, bk, wv, bv, *,
                     batch_block=None, matmul_dtype=None):
    """query: (B, Nq, D), key_value: (B, Nk, D); weights pre-transposed (D, D)."""
    B, Nq, D = query.shape
    Bk, Nk, Dk = key_value.shape
    assert Bk == B and Dk == D
    scale = float(D) ** (-0.5)
    out_dtype = query.dtype

    # Fold the query scale into the projection weights/bias (trace-time).
    wq_s = wq * scale
    bq_s = (bq * scale).reshape(1, D)
    # Fused K|V projection: single (D, 2D) weight, (1, 2D) bias.
    wkv = jnp.concatenate([wk, wv], axis=1)
    bkv = jnp.concatenate([bk, bv], axis=0).reshape(1, 2 * D)

    if matmul_dtype is not None:
        # Opt-in reduced-precision MXU path (v5e/v6e); accumulation stays f32.
        query = query.astype(matmul_dtype)
        key_value = key_value.astype(matmul_dtype)
        wq_s = wq_s.astype(matmul_dtype)
        bq_s = bq_s.astype(matmul_dtype)
        wkv = wkv.astype(matmul_dtype)
        bkv = bkv.astype(matmul_dtype)

    budget, vmem_limit = _vmem_budget_and_limit()
    if batch_block is None:
        batch_block = _pick_batch_block(B, Nq, Nk, D, query.dtype.itemsize,
                                        budget)
    bb = batch_block
    assert B % bb == 0, "batch_block must divide the batch size"

    # Flatten (batch, seq) rows outside the kernel (free, contiguous reshape)
    # so each grid step projects bb*Nq / bb*Nk rows in a single MXU pass.
    q2 = query.reshape(B * Nq, D)
    kv2 = key_value.reshape(B * Nk, D)

    kernel = functools.partial(_linear_attention_kernel, bb, Nq, Nk, D)

    grid_spec = pltpu.PrefetchScalarGridSpec(
        num_scalar_prefetch=0,
        grid=(B // bb,),
        in_specs=[
            pl.BlockSpec((bb * Nq, D), lambda b: (b, 0)),   # query rows
            pl.BlockSpec((bb * Nk, D), lambda b: (b, 0)),   # key_value rows
            pl.BlockSpec((D, D), lambda b: (0, 0)),         # Wq^T * scale
            pl.BlockSpec((1, D), lambda b: (0, 0)),         # bq * scale
            pl.BlockSpec((D, 2 * D), lambda b: (0, 0)),     # [Wk | Wv]
            pl.BlockSpec((1, 2 * D), lambda b: (0, 0)),     # [bk | bv]
        ],
        out_specs=pl.BlockSpec((bb, Nq, D), lambda b: (b, 0, 0)),
    )

    itemsize = query.dtype.itemsize
    flops = 2 * B * (Nq * D * D          # q projection
                     + Nk * D * 2 * D    # fused k|v projection
                     + Nk * D * D        # context = k^T v
                     + Nq * D * D)       # out = q @ context
    cost = pl.CostEstimate(
        flops=flops,
        transcendentals=B * (Nq + Nk) * D,
        bytes_accessed=(2 * B * Nq * D + B * Nk * D) * itemsize
                       + (3 * D * D + 3 * D) * itemsize,
    )

    return pl.pallas_call(
        kernel,
        out_shape=jax.ShapeDtypeStruct((B, Nq, D), out_dtype),
        grid_spec=grid_spec,
        compiler_params=pltpu.CompilerParams(
            dimension_semantics=("parallel",),
            vmem_limit_bytes=int(vmem_limit)),
        cost_estimate=cost,
    )(q2, kv2, wq_s, bq_s, wkv, bkv)


def linear_attention_ref(query, key_value, wq, bq, wk, bk, wv, bv):
    """Plain-JAX reference mirroring the PyTorch forward."""
    D = query.shape[-1]
    scale = float(D) ** (-0.5)
    q = (query @ wq + bq) * scale
    k = key_value @ wk + bk
    v = key_value @ wv + bv
    q = jax.nn.softmax(q, axis=-1)
    k = jax.nn.softmax(k, axis=-2)
    context = jnp.einsum("bkd,bke->bde", k, v)
    return jnp.einsum("bqd,bde->bqe", q, context)


if __name__ == "__main__":
    B, Nq, Nk, D = 2, 8, 8, 32
    key = jax.random.PRNGKey(0)
    k_query, k_kv, k_wq, k_bq, k_wk, k_bk, k_wv, k_bv = jax.random.split(key, 8)

    query = jax.random.normal(k_query, (B, Nq, D), dtype=jnp.float32)
    key_value = jax.random.normal(k_kv, (B, Nk, D), dtype=jnp.float32)

    # nn.Linear(emb_dim, emb_dim) weights; stored pre-transposed as (D_in, D_out).
    init_scale = D ** (-0.5)
    wq = jax.random.uniform(k_wq, (D, D), jnp.float32, -init_scale, init_scale)
    bq = jax.random.uniform(k_bq, (D,), jnp.float32, -init_scale, init_scale)
    wk = jax.random.uniform(k_wk, (D, D), jnp.float32, -init_scale, init_scale)
    bk = jax.random.uniform(k_bk, (D,), jnp.float32, -init_scale, init_scale)
    wv = jax.random.uniform(k_wv, (D, D), jnp.float32, -init_scale, init_scale)
    bv = jax.random.uniform(k_bv, (D,), jnp.float32, -init_scale, init_scale)

    out = linear_attention(query, key_value, wq, bq, wk, bk, wv, bv)
    out = jax.block_until_ready(out)

    ref = linear_attention_ref(query, key_value, wq, bq, wk, bk, wv, bv)
    assert out.shape == (B, Nq, D)
    # f32 end-to-end, exact softmax denominators -> near-exact vs reference.
    assert jnp.allclose(out, ref, atol=1e-4, rtol=1e-4), "mismatch vs reference"

    print("KERNEL_OK")
</pallas_src>

<mosaic_0001>
module attributes {stable_mosaic.version = 11 : i64} {
  func.func @_linear_attention_kernel(%arg0: i32, %arg1: memref<8x32xf32, #tpu.memory_space<vmem>>, %arg2: memref<8x32xf32, #tpu.memory_space<vmem>>, %arg3: memref<32x32xf32, #tpu.memory_space<vmem>>, %arg4: memref<1x32xf32, #tpu.memory_space<vmem>>, %arg5: memref<32x64xf32, #tpu.memory_space<vmem>>, %arg6: memref<1x64xf32, #tpu.memory_space<vmem>>, %arg7: memref<1x8x32xf32, #tpu.memory_space<vmem>>) attributes {dimension_semantics = [#tpu.dimension_semantics<parallel>], iteration_bounds = array<i64: 2>, scalar_prefetch = 0 : i64, scratch_operands = 0 : i64, tpu.core_type = #tpu.core_type<tc>, window_params = [{transform_indices = @transform_0, window_bounds = array<i64: 8, 32>}, {transform_indices = @transform_1, window_bounds = array<i64: 8, 32>}, {pipeline_mode = #tpu.pipeline_mode<synchronous>, transform_indices = @transform_2, window_bounds = array<i64: 32, 32>}, {pipeline_mode = #tpu.pipeline_mode<synchronous>, transform_indices = @transform_3, window_bounds = array<i64: 1, 32>}, {pipeline_mode = #tpu.pipeline_mode<synchronous>, transform_indices = @transform_4, window_bounds = array<i64: 32, 64>}, {pipeline_mode = #tpu.pipeline_mode<synchronous>, transform_indices = @transform_5, window_bounds = array<i64: 1, 64>}, {transform_indices = @transform_6, window_bounds = array<i64: 1, 8, 32>}]} {
    %c0 = arith.constant 0 : index
    %c0_0 = arith.constant 0 : index
    %0 = vector.load %arg1[%c0, %c0_0] : memref<8x32xf32, #tpu.memory_space<vmem>>, vector<8x32xf32>
    %c0_1 = arith.constant 0 : index
    %c0_2 = arith.constant 0 : index
    %1 = vector.load %arg3[%c0_1, %c0_2] : memref<32x32xf32, #tpu.memory_space<vmem>>, vector<32x32xf32>
    %cst = arith.constant dense<0.000000e+00> : vector<8x32xf32>
    %2 = tpu.matmul %0, %1, %cst {dimension_numbers = #tpu.dot_dimension_numbers<[1], [0], [0], [1], [0, 0, 1, 1], [], []>} : vector<8x32xf32>, vector<32x32xf32>, vector<8x32xf32> -> vector<8x32xf32>
    %c0_3 = arith.constant 0 : index
    %c0_4 = arith.constant 0 : index
    %3 = vector.load %arg4[%c0_3, %c0_4] : memref<1x32xf32, #tpu.memory_space<vmem>>, vector<1x32xf32>
    %4 = vector.broadcast %3 : vector<1x32xf32> to vector<8x32xf32>
    %5 = arith.addf %2, %4 : vector<8x32xf32>
    %c0_5 = arith.constant 0 : index
    %c0_6 = arith.constant 0 : index
    %6 = vector.load %arg2[%c0_5, %c0_6] : memref<8x32xf32, #tpu.memory_space<vmem>>, vector<8x32xf32>
    %c0_7 = arith.constant 0 : index
    %c0_8 = arith.constant 0 : index
    %7 = vector.load %arg5[%c0_7, %c0_8] : memref<32x64xf32, #tpu.memory_space<vmem>>, vector<32x64xf32>
    %cst_9 = arith.constant dense<0.000000e+00> : vector<8x64xf32>
    %8 = tpu.matmul %6, %7, %cst_9 {dimension_numbers = #tpu.dot_dimension_numbers<[1], [0], [0], [1], [0, 0, 1, 1], [], []>} : vector<8x32xf32>, vector<32x64xf32>, vector<8x64xf32> -> vector<8x64xf32>
    %c0_10 = arith.constant 0 : index
    %c0_11 = arith.constant 0 : index
    %9 = vector.load %arg6[%c0_10, %c0_11] : memref<1x64xf32, #tpu.memory_space<vmem>>, vector<1x64xf32>
    %10 = vector.broadcast %9 : vector<1x64xf32> to vector<8x64xf32>
    %11 = arith.addf %8, %10 : vector<8x64xf32>
    %12 = vector.extract_strided_slice %11 {offsets = [0, 0], sizes = [8, 32], strides = [1, 1]} : vector<8x64xf32> to vector<8x32xf32>
    %13 = vector.shape_cast %12 : vector<8x32xf32> to vector<1x8x32xf32>
    %14 = vector.extract_strided_slice %11 {offsets = [0, 32], sizes = [8, 32], strides = [1, 1]} : vector<8x64xf32> to vector<8x32xf32>
    %15 = vector.shape_cast %14 : vector<8x32xf32> to vector<1x8x32xf32>
    %cst_12 = arith.constant dense<0xFF800000> : vector<8xf32>
    %16 = vector.multi_reduction <maximumf>, %5, %cst_12 [1] : vector<8x32xf32> to vector<8xf32>
    %17 = vector.shape_cast %16 : vector<8xf32> to vector<8x1xf32>
    %18 = vector.broadcast %17 : vector<8x1xf32> to vector<8x32xf32>
    %19 = arith.subf %5, %18 : vector<8x32xf32>
    %20 = math.exp %19 : vector<8x32xf32>
    %cst_13 = arith.constant dense<0.000000e+00> : vector<8xf32>
    %21 = vector.multi_reduction <add>, %20, %cst_13 [1] : vector<8x32xf32> to vector<8xf32>
    %22 = vector.shape_cast %21 : vector<8xf32> to vector<8x1xf32>
    %23 = vector.broadcast %22 : vector<8x1xf32> to vector<8x32xf32>
    %24 = arith.divf %20, %23 : vector<8x32xf32>
    %25 = vector.shape_cast %24 : vector<8x32xf32> to vector<1x8x32xf32>
    %cst_14 = arith.constant dense<0xFF800000> : vector<1x32xf32>
    %26 = vector.multi_reduction <maximumf>, %13, %cst_14 [1] : vector<1x8x32xf32> to vector<1x32xf32>
    %27 = vector.shape_cast %26 : vector<1x32xf32> to vector<1x1x32xf32>
    %28 = vector.broadcast %27 : vector<1x1x32xf32> to vector<1x8x32xf32>
    %29 = arith.subf %13, %28 : vector<1x8x32xf32>
    %30 = math.exp %29 : vector<1x8x32xf32>
    %cst_15 = arith.constant dense<0.000000e+00> : vector<1x32xf32>
    %31 = vector.multi_reduction <add>, %30, %cst_15 [1] : vector<1x8x32xf32> to vector<1x32xf32>
    %32 = vector.shape_cast %31 : vector<1x32xf32> to vector<1x1x32xf32>
    %33 = vector.broadcast %32 : vector<1x1x32xf32> to vector<1x8x32xf32>
    %34 = arith.divf %30, %33 : vector<1x8x32xf32>
    "tpu.trace_start"() <{level = 10 : i32, message = "bkd,bke->bde"}> : () -> ()
    %cst_16 = arith.constant dense<0.000000e+00> : vector<1x32x32xf32>
    %35 = tpu.matmul %34, %15, %cst_16 {dimension_numbers = #tpu.dot_dimension_numbers<[1], [1], [2], [2], [0, 0, 0, 2, 1, 2], [0], [0]>} : vector<1x8x32xf32>, vector<1x8x32xf32>, vector<1x32x32xf32> -> vector<1x32x32xf32>
    "tpu.trace_stop"() : () -> ()
    "tpu.trace_start"() <{level = 10 : i32, message = "bqd,bde->bqe"}> : () -> ()
    %cst_17 = arith.constant dense<0.000000e+00> : vector<1x8x32xf32>
    %36 = tpu.matmul %25, %35, %cst_17 {dimension_numbers = #tpu.dot_dimension_numbers<[2], [1], [1], [2], [0, 0, 0, 1, 1, 2], [0], [0]>} : vector<1x8x32xf32>, vector<1x32x32xf32>, vector<1x8x32xf32> -> vector<1x8x32xf32>
    "tpu.trace_stop"() : () -> ()
    %c0_18 = arith.constant 0 : index
    %c0_19 = arith.constant 0 : index
    %c0_20 = arith.constant 0 : index
    %37 = vector.load %arg7[%c0_18, %c0_19, %c0_20] : memref<1x8x32xf32, #tpu.memory_space<vmem>>, vector<1x8x32xf32>
    tpu.vector_store %arg7[%c0_18, %c0_19, %c0_20], %36 {strides = array<i32>} : memref<1x8x32xf32, #tpu.memory_space<vmem>>, vector<1x8x32xf32>,
    return
  }
  func.func @transform_0(%arg0: i32) -> (i32, i32) {
    %c0_i32 = arith.constant 0 : i32
    %c0_i32_0 = arith.constant 0 : i32
    return %arg0, %c0_i32 : i32, i32
  }
  func.func @transform_1(%arg0: i32) -> (i32, i32) {
    %c0_i32 = arith.constant 0 : i32
    %c0_i32_0 = arith.constant 0 : i32
    return %arg0, %c0_i32 : i32, i32
  }
  func.func @transform_2(%arg0: i32) -> (i32, i32) {
    %c0_i32 = arith.constant 0 : i32
    %c0_i32_0 = arith.constant 0 : i32
    %c0_i32_1 = arith.constant 0 : i32
    return %c0_i32, %c0_i32_0 : i32, i32
  }
  func.func @transform_3(%arg0: i32) -> (i32, i32) {
    %c0_i32 = arith.constant 0 : i32
    %c0_i32_0 = arith.constant 0 : i32
    %c0_i32_1 = arith.constant 0 : i32
    return %c0_i32, %c0_i32_0 : i32, i32
  }
  func.func @transform_4(%arg0: i32) -> (i32, i32) {
    %c0_i32 = arith.constant 0 : i32
    %c0_i32_0 = arith.constant 0 : i32
    %c0_i32_1 = arith.constant 0 : i32
    return %c0_i32, %c0_i32_0 : i32, i32
  }
  func.func @transform_5(%arg0: i32) -> (i32, i32) {
    %c0_i32 = arith.constant 0 : i32
    %c0_i32_0 = arith.constant 0 : i32
    %c0_i32_1 = arith.constant 0 : i32
    return %c0_i32, %c0_i32_0 : i32, i32
  }
  func.func @transform_6(%arg0: i32) -> (i32, i32, i32) {
    %c0_i32 = arith.constant 0 : i32
    %c0_i32_0 = arith.constant 0 : i32
    %c0_i32_1 = arith.constant 0 : i32
    return %arg0, %c0_i32, %c0_i32_0 : i32, i32, i32
  }
}

</mosaic_0001>

<bundles_post_ra>
// kernel: tpu_custom_call.1
= control target key start
LH: loop header
LB: loop body
LE: loop exit
PB: predicated region body
PF: predicated region fallthrough
CT: control target
= control target key end

     0   :  { %s1240_s0 = inlined_call_operand.hbm [shape: f32[16,32], index: 0, kind: input, shape index: {}]   ;;  %s1241_s1 = inlined_call_operand.hbm [shape: f32[16,32], index: 1, kind: input, shape index: {}]   ;;  %s1242_s2 = inlined_call_operand.hbm [shape: f32[32,32], index: 2, kind: input, shape index: {}]   ;;  %s1243_s3 = inlined_call_operand.vmem [shape: f32[1,32], index: 3, kind: input, shape index: {}]   ;;  %s1244_s4 = inlined_call_operand.hbm [shape: f32[32,64], index: 4, kind: input, shape index: {}]   ;;  %s1245_s5 = inlined_call_operand.vmem [shape: f32[1,64], index: 5, kind: input, shape index: {}]   ;;  %s1246_s6 = inlined_call_operand.hbm [shape: f32[2,8,32], index: 6, kind: output, shape index: {}]  }
   0x1   :  { %1250 = sst [smem:[#allocation19_spill]] %s1242_s2 }
   0x2   :  { %1251 = sst [smem:[#allocation20_spill]] %s1244_s4 }
   0x3   :  { %11 = vsyncpa [#allocation3], 0 }
   0x4   :  { %13 = vsyncpa [#allocation3 + $0x1], 0 }
   0x5   :  { %14 = vsyncpa [#allocation6], 0 }
   0x6   :  { %16 = vsyncpa [#allocation6 + $0x1], 0 }
   0x7   :  { %17 = vsyncpa [#allocation9], 0 }
   0x8   :  { %18 = vsyncpa [#allocation4], 0 }
   0x9   :  { %20 = vsyncpa [#allocation4 + $0x1], 0  ;;  %s1045_s21 = smov 0   ;;  %s1047_s22 = smov 0  }
   0xa   :  { %s1049_s23 = smov 0   ;;  %s1051_s24 = smov 0  }
   0xb LB: > { %1252 = sst [smem:[#allocation16_spill]] %s999_s23  ;;  %s1069_s28 = sadd.s32 4294967295, %s1003_s24   ;;  %s1003_s24 = sphi %s1051_s24, %s1264_s24   ;;  %s999_s23 = sphi %s1049_s23, %s1266_s23   ;;  %s995_s22 = sphi %s1047_s22, %s1268_s22   ;;  %s991_s21 = sphi %s1045_s21, %s1267_s21  }
   0xc   : > { %s1253_s2 = sld [smem:[#allocation19_spill]]  ;;  %p693_p0 = scmp.ge.s32.totalorder %s1003_s24, 1 }
   0xd   : > { %p47_p1 = scmp.eq.s32.totalorder %s1069_s28, 0  ;;  %p193_p2 = scmp.lt.s32.totalorder %s1003_s24, 3 }
   0xe   : > { %s1005_s30 = smov [#allocation7]   ;;  %s1255_s4 = sld [smem:[#allocation20_spill]] }
   0xf   : > { %p1074_p3 = pnand %p693_p0, %p193_p2  ;;  %s206_s7 = sshll.u32 %s1005_s30, 4  ;;  %s207_s7 = int_to_ptr.vmem [resolvable:$true] %s206_s7 }
  0x10   : > { %s1006_s11 = smov [#allocation8]   ;;  %s1007_s13 = smov 128  }
  0x11   : > { %p733_p4 = pneg %p1074_p3  ;;  %s223_s12 = sshll.u32 %s1006_s11, 4  ;;  %s224_s12 = int_to_ptr.vmem [resolvable:$true] %s223_s12 }
  0x12   : > { %s204_s27 = sshll.u32 %s1253_s2, 4  ;;  %s1008_s14 = smov 8   ;;  %s205_s27 = int_to_ptr.hbm [resolvable:$true] %s204_s27 }
  0x13   : > { %p734_p6 = pnand %p733_p4, %p47_p1  ;;  %s692_s15 = sadd.s32 4294967294, %s1003_s24  }
  0x14   : > { %s221_s10 = sshll.u32 %s1255_s4, 4  ;;  %s1088_s16 = sadd.s32 1, %s1003_s24   ;;  %s222_s10 = int_to_ptr.hbm [resolvable:$true] %s221_s10 }
  0x15   : > { %736 = dma.hbm_to_vmem [thread:$0]  (!%p734_p6), %s205_s27, 512, %s207_s7, [#allocation6], %s1007_s13, %s1007_s13, %s1008_s14  }
  0x16   : > { %739 = dma.hbm_to_vmem [thread:$0]  (!%p734_p6), %s222_s10, 512, %s224_s12, [#allocation9], %s1007_s13, %s1007_s13, %s1008_s14  }
  0x17   : > { %1256 = sst [smem:[#allocation17_spill]] %s1088_s16  ;;  %s30_s17 = ssub.s32 %s1003_s24, %s1088_s16 }
  0x18   : > { %s33_s18 = sadd.s32 1, %s999_s23  ;;  %p31_p7 = scmp.eq.s32.totalorder %s30_s17, 0 }
  0x19   : > { %p40_p8 = scmp.ne.s32.totalorder %s999_s23, %s995_s22  ;;  %p41_p9 = scmp.eq.s32.totalorder %s1003_s24, 0 }
  0x1a   : > { %p46_p10 = scmp.ne.s32.totalorder %s995_s22, %s991_s21  ;;  %p180_p13 = scmp.eq.s32.totalorder %s1069_s28, 1 }
  0x1b   : > { %s1099_s19 = scalar_select %p31_p7, %s999_s23, %s33_s18  }
  0x1c   : > { %p1101_p11 = por %p41_p9, %p40_p8  ;;  %p1107_p12 = por %p47_p1, %p46_p10 }
  0x1d   : > { %1257 = sst [smem:[#allocation18_spill]] %s1099_s19  ;;  %p186_p0 = scmp.eq.s32.totalorder %s692_s15, 1 }
  0x1e   : > { %p753_p2 = scmp.lt.s32.totalorder %s1003_s24, 2  ;;  %s240_s26 = sand.u32 1, %s999_s23  }
  0x1f   : > { %p1114_p4 = por %p180_p13, %p40_p8  ;;  %p1118_p6 = por %p186_p0, %p46_p10 }
  0x20   : > { %s1122_s7 = sshll.u32 %s240_s26, 3  ;;  %s698_s8 = sshll.u32 %s1003_s24, 3 }
  0x21   : > { %s248_s11 = scalar_lea.hbm %s1240_s0, %s698_s8  ;;  %s244_s12 = scalar_lea.vmem [#allocation2], %s1122_s7 }
  0x22   : > { %s252_s13 = sshll.u32 %s244_s12, 4  ;;  %s250_s14 = sshll.u32 %s248_s11, 4  ;;  %s253_s13 = int_to_ptr.vmem [resolvable:$true] %s252_s13  ;;  %s251_s14 = int_to_ptr.hbm [resolvable:$true] %s250_s14 }
  0x23   : > { %p1131_p7 = pnand %p753_p2, %p1101_p11  ;;  %s267_s2 = scalar_lea.hbm %s1241_s1, %s698_s8 }
  0x24   : > { %s259_s4 = sand.u32 1, %s1003_s24   ;;  %s241_s19 = scalar_lea.sflag [#allocation3], %s240_s26 }
  0x25   : > { %s865_s9 = sshra.s32 %s251_s14, 4  ;;  %p869_p9 = pneg %p1131_p7  ;;  %s866_s9 = int_to_ptr.hbm [resolvable:$true] %s865_s9 }
  0x26   : > { %s867_s10 = scalar_lea.hbm %s866_s9, 8  ;;  %s872_s12 = scalar_lea.hbm %s1240_s0, 16 }
  0x27   : > { %p868_p8 = scmp.ne.s32.totalorder %s866_s9, %s867_s10  ;;  %p873_p13 = scmp.lt.s32.totalorder %s866_s9, %s1240_s0 }
  0x28   : > { %p874_p0 = scmp.lt.s32.totalorder %s872_s12, %s867_s10 }
  0x29   : > { %p870_p10 = pnand %p869_p9, %p868_p8 }
  0x2a   : > { %p875_p2 = por %p874_p0, %p873_p13 }
  0x2b   : > { %p871_p11 = pneg %p870_p10 }
  0x2d   : > { %p876_p5 = pnand %p875_p2, %p871_p11 }
  0x2f   : > { %879 = shalt.err (!%p876_p5)
}
  0x30   : > { %743 = dma.hbm_to_vmem [thread:$0]  (!%p1131_p7), %s251_s14, 128, %s253_s13, %s241_s19  }
  0x31   : > { %s269_s26 = sshll.u32 %s267_s2, 4  ;;  %s263_s8 = scalar_lea.vmem [#allocation5], %s1122_s7  ;;  %s270_s26 = int_to_ptr.hbm [resolvable:$true] %s269_s26 }
  0x32   : > { %s271_s23 = sshll.u32 %s263_s8, 4  ;;  %s260_s20 = scalar_lea.sflag [#allocation6], %s259_s4  ;;  %s272_s23 = int_to_ptr.vmem [resolvable:$true] %s271_s23 }
  0x33   : > { %s895_s11 = sshra.s32 %s270_s26, 4  ;;  %s902_s12 = scalar_lea.hbm %s1241_s1, 16  ;;  %s896_s11 = int_to_ptr.hbm [resolvable:$true] %s895_s11 }
  0x34   : > { %s897_s16 = scalar_lea.hbm %s896_s11, 8  ;;  %p903_p5 = scmp.lt.s32.totalorder %s896_s11, %s1241_s1 }
  0x35   : > { %p898_p8 = scmp.ne.s32.totalorder %s896_s11, %s897_s16  ;;  %p904_p13 = scmp.lt.s32.totalorder %s902_s12, %s897_s16 }
  0x37   : > { %p900_p10 = pnand %p898_p8, %p869_p9  ;;  %p905_p0 = por %p904_p13, %p903_p5 }
  0x39   : > { %p901_p11 = pneg %p900_p10 }
  0x3b   : > { %p906_p2 = pnand %p905_p0, %p901_p11 }
  0x3d   : > { %909 = shalt.err (!%p906_p2)
}
  0x3e   : > { %746 = dma.hbm_to_vmem [thread:$0]  (!%p1131_p7), %s270_s26, 128, %s272_s23, %s260_s20  }
  0x3f   : > { %280 = sbr.rel (%p1074_p3) target bundleno = 732 (0x2dc), region = 44  ;;  %s1167_s2 = sand.u32 (!%p1074_p3), 1, %s995_s22  }
  0x40   : > { %s1170_s4 = sshll.u32 (!%p1074_p3), %s1167_s2, 3  ;;  %s283_s7 = scalar_lea.sflag (!%p1074_p3), [#allocation3], %s1167_s2 }
  0x41   : > { %s286_s16 = scalar_lea.vmem (!%p1074_p3), [#allocation2], %s1170_s4 }
  0x44   : > { %970 = dma.done.wait (%p1107_p12), %s283_s7, 128  }
  0x45   : > { %972 = vsyncadd (%p1107_p12), %s283_s7, 4294967168  ;;  %s292_s23 = sand.u32 1, %s1069_s28   ;;  %s296_s13 = scalar_lea.vmem [#allocation5], %s1170_s4 }
  0x46   : > { %s293_s29 = scalar_lea.sflag [#allocation6], %s292_s23 }
  0x47   : > { %974 = dma.done.wait (%p1107_p12), %s293_s29, 128  }
  0x48   : > { %976 = vsyncadd (%p1107_p12), %s293_s29, 4294967168 }
  0x49   : > { %978 = dma.done.wait (%p47_p1), [#allocation6], 512  }
  0x4a   : > { %980 = vsyncadd (%p47_p1), [#allocation6], 4294966784 }
  0x4b   : > { %982 = dma.done.wait (%p47_p1), [#allocation9], 512  }
  0x4c   : > { %984 = vsyncadd (%p47_p1), [#allocation9], 4294966784  ;;  %v345_v0 = vld [vmem:[#allocation7 + $0x18] sm:$0xff]  ;;  %v344_v2 = vld [vmem:[#allocation7 + $0x10] sm:$0xff]  ;;  %vm350_vm0 = vcmask 261120   ;;  %s1009_s26 = smov 96  }
  0x4d   : > { %v378_v1 = vld [vmem:[#allocation8 + $0x18] sm:$0xff]  ;;  %366 = vmatpush.msra.mxu0 %v345_v0  ;;  %v377_v3 = vld [vmem:[#allocation8 + $0x10] sm:$0xff]  ;;  %v343_v4 = vld [vmem:[#allocation7 + $0x8] sm:$0xff]  ;;  %vm498_vm5 = vcmask 64512   ;;  %s715_s8 = sshll.u32 %s1069_s28, 3  ;;  %s340_s10 = scalar_lea.vmem [#allocation10], %s1170_s4 }
  0x4e   : > { %398 = vmatpush.msra.mxu1 %v378_v1  ;;  %v376_v5 = vld [vmem:[#allocation8 + $0x8] sm:$0xff]  ;;  %v342_v6 = vld [vmem:[#allocation7] sm:$0xff]  ;;  %v374_v9 = vld [vmem:[%s296_s13] sm:$0xff]  ;;  %s575_s9 = scalar_lea.hbm %s1246_s6, %s715_s8  ;;  %s577_s12 = sshll.u32 %s340_s10, 4  ;;  %s578_s12 = int_to_ptr.vmem [resolvable:$true] %s577_s12 }
  0x4f   : > { %367 = vmatpush.msra.mxu0 %v344_v2  ;;  %v375_v7 = vld [vmem:[#allocation8] sm:$0xff]  ;;  %s579_s17 = sshll.u32 %s575_s9, 4  ;;  %s565_s19 = scalar_lea.sflag [#allocation4], %s1167_s2  ;;  %s580_s17 = int_to_ptr.hbm [resolvable:$true] %s579_s17 }
  0x50   : > { %399 = vmatpush.msra.mxu1 %v377_v3  ;;  %v341_v8 = vld [vmem:[%s286_s16] sm:$0xff]  ;;  %s939_s7 = sshra.s32 %s580_s17, 4  ;;  %s945_s29 = scalar_lea.hbm %s1246_s6, 16  ;;  %s940_s7 = int_to_ptr.hbm [resolvable:$true] %s939_s7 }
  0x51   : > { %368 = vmatpush.msra.mxu0 %v343_v4  ;;  %v795_v10 = vld [vmem:[%s1243_s3] ss:$0 sm:$0xff]  ;;  %s941_s16 = scalar_lea.hbm %s940_s7, 8  ;;  %p946_p7 = scmp.lt.s32.totalorder %s940_s7, %s1246_s6 }
  0x52   : > { %400 = vmatpush.msra.mxu1 %v376_v5  ;;  %v796_v11 = vld [vmem:[%s1245_s5] ss:$0 sm:$0xff]  ;;  %p942_p1 = scmp.ne.s32.totalorder %s940_s7, %s941_s16  ;;  %p947_p9 = scmp.lt.s32.totalorder %s945_s29, %s941_s16 }
  0x53   : > { %369 = vmatpush.msra.mxu0 %v342_v6 }
  0x54   : > { %401 = vmatpush.msra.mxu1 %v375_v7  ;;  %707 = vmatmul.msk.f32.vlgmr.msra.gmra.mxu0 %vm350_vm0, %v341_v8  ;;  %p943_p3 = pnand %p942_p1, %p1114_p4  ;;  %p948_p8 = por %p947_p9, %p946_p7 }
  0x55   : > { %708 = vmatmul.msk.f32.vlgmr.msra.gmra.mxu1 %vm350_vm0, %v374_v9 }
  0x56   : > { %p944_p12 = pneg %p943_p3 }
  0x58   : > { %p949_p10 = pnand %p948_p8, %p944_p12 }
  0xd1   : > { %v371_v12 = vpop.f32.mrf.mxu0 }
  0xd2   : > { %v403_v13 = vpop.f32.mrf.mxu1  ;;  %v372_v14 = vadd.f32 %v795_v10, %v371_v12 }
  0xd3   : > { %v404_v15 = vadd.f32 %v796_v11, %v403_v13 }
  0xd4   : > { %v406_v17 = vsel %vm350_vm0, %v372_v14, -inf }
  0xd5   : > { %v430_v16 = vsel %vm350_vm0, %v404_v15, -inf  ;;  %495 = vrot.lane.b32.xlu0 %v404_v15, %s1009_s26  ;;  %407 = vmax.xlane.f32.xlu1 %v406_v17 }
  0xd6   : > { %v431_v18 = vrot.slane %v430_v16, 4 }
  0xd8   : > { %v432_v19 = vmax.f32 %v430_v16, %v431_v18 }
  0xda   : > { %v433_v20 = vrot.slane %v432_v19, 2 }
  0xdc   : > { %v434_v21 = vmax.f32 %v432_v19, %v433_v20 }
  0xde   : > { %v435_v22 = vrot.slane %v434_v21, 1 }
  0xe0   : > { %v436_v23 = vmax.f32 %v434_v21, %v435_v22 }
  0xe2   : > { %v437_v24 = vsub.f32 %v404_v15, %v436_v23 }
  0xe4   : > { %v438_v25 = vmul.f32 1.442695, %v437_v24 }
  0xe6   : > { %797 = vpow2.f32 %v438_v25 }
  0xec   : > { %v798_v26 = vpop.eup %797 }
  0xed   : > { %v440_v27 = vsel %vm350_vm0, %v798_v26, 0.0 }
  0xee   : > { %v441_v28 = vrot.slane %v440_v27, 4 }
  0xf0   : > { %v442_v29 = vadd.f32 %v441_v28, %v440_v27 }
  0xf2   : > { %v443_v30 = vrot.slane %v442_v29, 2 }
  0xf4   : > { %v444_v31 = vadd.f32 %v443_v30, %v442_v29 }
  0xf6   : > { %v445_v32 = vrot.slane %v444_v31, 1 }
  0xf8   : > { %v446_v33 = vadd.f32 %v445_v32, %v444_v31 }
  0xfa   : > { %799 = vrcp.f32 %v446_v33  ;;  %v458_v37 = vand.u32 2147483648, %v446_v33  ;;  %v456_v39 = vand.u32 2147483647, %v446_v33  ;;  %vm452_vm2 = vweird.f32 %v446_v33 }
  0xfc   : > { %v459_v41 = vor.u32 1.1754944e-38, %v458_v37  ;;  %vm457_vm4 = vcmp.eq.f32.partialorder %v456_v39, 8.507059e+37 }
 0x100   : > { %v800_v34 = vpop.eup %799 }
 0x101   : > { %v448_v35 = vmul.f32 %v800_v34, %v446_v33  ;;  %vm453_vm1 = vweird.f32 %v800_v34 }
 0x102   : > { %vm454_vm3 = vmor %vm452_vm2, %vm453_vm1 }
 0x103   : > { %v449_v36 = vsub.f32 1.0, %v448_v35 }
 0x105   : > { %v450_v38 = vmul.f32 %v800_v34, %v449_v36 }
 0x107   : > { %v451_v40 = vadd.f32 %v800_v34, %v450_v38 }
 0x109   : > { %v455_v42 = vsel %vm454_vm3, %v800_v34, %v451_v40 }
 0x10a   : > { %v460_v43 = vsel %vm457_vm4, %v459_v41, %v455_v42 }
 0x10b   : > { %v461_v44 = vmul.f32 %v798_v26, %v460_v43 }
 0x10d   : > { %462 = vxpose.xlu0.b32.start.end [1/1] (short) (narrow) %v461_v44, 32 }
 0x147   : > { %v496_v45 = vpop.permute.xlu0 %495 }
 0x148   : > { %526 = vmatpush.msrb.mxu0 %v496_v45  ;;  %718 = vmatpush.msra.mxu2 %v496_v45  ;;  %v408_v46 = vpop.xlane.xlu1 %407 }
 0x149   : > { %v409_v47 = vsub.f32 %v372_v14, %v408_v46 }
 0x14b   : > { %v410_v48 = vmul.f32 1.442695, %v409_v47 }
 0x14d   : > { %801 = vpow2.f32 %v410_v48 }
 0x153   : > { %v802_v49 = vpop.eup %801 }
 0x154   : > { %v412_v50 = vsel %vm350_vm0, %v802_v49, 0.0 }
 0x155   : > { %413 = vadd.xlane.f32.xlu1 %v412_v50 }
 0x1b1   : > { %v478_v51 = vpop.trf.xlu0 }
 0x1b2   : > { %709 = vmatmul.msk.f32.vlgmr.msrb.gmra.mxu0 %vm498_vm5, %v478_v51 }
 0x1b9   : > { %v479_v52 = vpop.trf.xlu0 }
 0x1ba   : > { %710 = vmatmul.msk.f32.vlgmr.msra.gmra.mxu2 %vm498_vm5, %v479_v52 }
 0x1c1   : > { %v480_v53 = vpop.trf.xlu0 }
 0x1c2   : > { %711 = vmatmul.msk.f32.gmra.mxu2 %vm498_vm5, %v480_v53 }
 0x1c8   : > { %v414_v55 = vpop.xlane.xlu1 %413 }
 0x1c9   : > { %v481_v54 = vpop.trf.xlu0  ;;  %803 = vrcp.f32 %v414_v55  ;;  %v426_v63 = vand.u32 2147483648, %v414_v55  ;;  %vm420_vm7 = vweird.f32 %v414_v55  ;;  %v424_v0 = vand.u32 2147483647, %v414_v55 }
 0x1ca   : > { %712 = vmatmul.msk.f32.gmra.mxu2 %vm498_vm5, %v481_v54 }
 0x1cb   : > { %v427_v3 = vor.u32 1.1754944e-38, %v426_v63  ;;  %vm425_vm9 = vcmp.eq.f32.partialorder %v424_v0, 8.507059e+37 }
 0x1cf   : > { %v804_v56 = vpop.eup %803 }
 0x1d0   : > { %v416_v57 = vmul.f32 %v804_v56, %v414_v55  ;;  %vm421_vm6 = vweird.f32 %v804_v56 }
 0x1d1   : > { %vm422_vm8 = vmor %vm420_vm7, %vm421_vm6 }
 0x1d2   : > { %v417_v59 = vsub.f32 1.0, %v416_v57 }
 0x1d4   : > { %v418_v60 = vmul.f32 %v804_v56, %v417_v59 }
 0x1d6   : > { %v419_v62 = vadd.f32 %v804_v56, %v418_v60 }
 0x1d8   : > { %v423_v2 = vsel %vm422_vm8, %v804_v56, %v419_v62 }
 0x1d9   : > { %v428_v4 = vsel %vm425_vm9, %v427_v3, %v423_v2 }
 0x1da   : > { %v429_v6 = vmul.f32 %v802_v49, %v428_v4 }
 0x22f   : > { %v528_v5 = vpop.f32.mrf.mxu0 }
 0x23d   : > { %v531_v58 = vpop.f32.mrf.mxu2 }
 0x245   : > { %v534_v61 = vpop.f32.mrf.mxu2 }
 0x24d   : > { %v537_v1 = vpop.f32.mrf.mxu2 }
 0x24e   : > { %555 = vmatpush.msra.mxu3 %v537_v1 }
 0x250   : > { %556 = vmatpush.msra.mxu3 %v534_v61 }
 0x252   : > { %557 = vmatpush.msra.mxu3 %v531_v58 }
 0x254   : > { %558 = vmatpush.msra.mxu3 %v528_v5 }
 0x255   : > { %713 = vmatmul.msk.f32.vlgmr.msra.gmra.mxu3 %vm350_vm0, %v429_v6 }
 0x2d8   : > { %v560_v7 = vpop.f32.mrf.mxu3 }
 0x2d9   : > { %563 = vst.msk [vmem:[%s340_s10] sm:$0xff] %vm350_vm0, %v560_v7 }
 0x2da   : > { %952 = shalt.err (!%p949_p10)
}
 0x2db   : > { %731 = dma.vmem_to_hbm [thread:$0]  (%p1114_p4), %s578_s12, 128, %s580_s17, %s565_s19  }
 0x2dc PF: > { %s591_s2 = sand.u32 1, %s991_s21   ;;  %p1263_p11 = scmp.ge.s32.totalorder %s1003_s24, 2 }
 0x2dd   : > { %s592_s25 = scalar_lea.sflag [#allocation4], %s591_s2 }
 0x2de   : > { %p748_p5 = pnand %p1263_p11, %p1118_p6 }
 0x2e0   : > { %p749_p13 = pneg %p748_p5 }
 0x2e2   : > { %986 = dma.done.wait (%p749_p13), %s592_s25, 128  }
 0x2e3   : > { %988 = vsyncadd (%p749_p13), %s592_s25, 4294967168  ;;  %s1264_s24 = sld [smem:[#allocation17_spill]]  ;;  %s1267_s21 = smov %s995_s22 }
 0x2e4   : > { %s1265_s14 = sld [smem:[#allocation16_spill]] }
 0x2e5   : > { %s1266_s23 = sld [smem:[#allocation18_spill]] }
 0x2e9   : > { %p23_p0 = scmp.ge.s32.totalorder %s1264_s24, 4  }
 0x2ea   : > { %s1268_s22 = smov %s1265_s14 }
 0x2eb   :  { %25 = sbr.rel (!%p23_p0) target bundleno = 11 (0xb), region = 110 }
 0x2f0   :  { %598 = vsyncpa [#allocation3], 1 }
 0x2f1   :  { %600 = vsyncpa [#allocation3 + $0x1], 1 }
 0x2f2   :  { %601 = vsyncpa [#allocation6], 1 }
 0x2f3   :  { %603 = vsyncpa [#allocation6 + $0x1], 1 }
 0x2f4   :  { %604 = vsyncpa [#allocation9], 1 }
 0x2f5   :  { %605 = vsyncpa [#allocation4], 1 }
 0x2f6   :  { %607 = vsyncpa [#allocation4 + $0x1], 1 }

</bundles_post_ra>
